<compile_context>
chip_gen: v7x
topology: tpu7x:2x2x1
jax: 0.10.0
libtpu: 0.0.40
codegen_flags: <defaults>
</compile_context>

<pallas_src>
import jax
import jax.numpy as jnp
from jax import lax
from jax.experimental import pallas as pl
from jax.experimental.pallas import tpu as pltpu

LANES = 128                 # lane width: batch maps onto lanes
SUB = 8                     # sublanes per inner strip (one f32 vreg per feature)
MAX_TILE_SUB = 1024         # <=1024 sublanes/step -> ~2.5 MiB/block, ~5-6 MiB dbl-buffered

D_IN, D_H1, D_H2, D_OUT = 4, 8, 4, 1


def _cdiv(a, b):
    return -(-a // b)


def _round_up(a, b):
    return _cdiv(a, b) * b


def _critic_kernel(s_ref, w1_ref, b1_ref, w2_ref, b2_ref, w3_ref, b3_ref, o_ref):
    """One batch tile: s_ref [4, TILE_SUB, 128] -> o_ref [TILE_SUB, 128]."""
    # Hoist every SMEM scalar read above the strip loop (read once per grid
    # step); the vector-scalar FMAs below take these straight from sregs, so
    # the strip loop body is pure VPU work.
    w1 = [[w1_ref[i, j] for j in range(D_H1)] for i in range(D_IN)]
    b1 = [b1_ref[j] for j in range(D_H1)]
    w2 = [[w2_ref[i, j] for j in range(D_H2)] for i in range(D_H1)]
    b2 = [b2_ref[j] for j in range(D_H2)]
    w3 = [w3_ref[i, 0] for i in range(D_H2)]
    b3 = b3_ref[0]

    n_strips = s_ref.shape[1] // SUB

    def strip(k, carry):
        r = pl.multiple_of(k * SUB, SUB)
        x = [s_ref[i, pl.ds(r, SUB), :] for i in range(D_IN)]      # 4 live vregs

        # Layer 1: 4 -> 8, ReLU
        h1 = []
        for j in range(D_H1):
            acc = w1[0][j] * x[0]
            for i in range(1, D_IN):
                acc = acc + w1[i][j] * x[i]
            h1.append(jnp.maximum(acc + b1[j], 0.0))

        # Layer 2: 8 -> 4, ReLU
        h2 = []
        for j in range(D_H2):
            acc = w2[0][j] * h1[0]
            for i in range(1, D_H1):
                acc = acc + w2[i][j] * h1[i]
            h2.append(jnp.maximum(acc + b2[j], 0.0))

        # Layer 3: 4 -> 1 value head; lane-dense full-width store.
        v = w3[0] * h2[0]
        for i in range(1, D_H2):
            v = v + w3[i] * h2[i]
        o_ref[pl.ds(r, SUB), :] = v + b3
        return carry

    lax.fori_loop(0, n_strips, strip, 0, unroll=min(4, n_strips))


def _tiling(B):
    """Pick (n_tiles, tile_sub): big blocks, VMEM-safe, >=2 tiles when possible."""
    sub_needed = _round_up(max(1, _cdiv(B, LANES)), SUB)
    n_tiles = _cdiv(sub_needed, MAX_TILE_SUB)
    if n_tiles == 1 and sub_needed > SUB:
        n_tiles = 2                      # v7x megacore: keep both TensorCores busy
    tile_sub = _round_up(_cdiv(sub_needed, n_tiles), SUB)
    return n_tiles, tile_sub


def nn_critic_forward(s, params):
    """s: [B, 4] float32 -> value: [B, 1] float32."""
    w1, b1, w2, b2, w3, b3 = params
    B = s.shape[0]
    n_tiles, tile_sub = _tiling(B)
    B_pad = n_tiles * tile_sub * LANES

    # Wrapper-side layout plumbing: batch onto the lane axis, one contiguous
    # HBM slab per grid block.  [B,4] -> [n_tiles, 4, tile_sub, 128].
    s_pad = jnp.pad(s.astype(jnp.float32), ((0, B_pad - B), (0, 0)))
    s_t = s_pad.reshape(n_tiles, tile_sub, LANES, D_IN).transpose(0, 3, 1, 2)

    smem = pl.BlockSpec(memory_space=pltpu.MemorySpace.SMEM)
    block_bytes = (D_IN + 1) * tile_sub * LANES * 4          # one in + one out block
    vmem_limit = int(min(32 * 1024 * 1024, max(4 * 1024 * 1024, 4 * block_bytes)))

    out = pl.pallas_call(
        _critic_kernel,
        out_shape=jax.ShapeDtypeStruct((n_tiles, tile_sub, LANES), jnp.float32),
        grid=(n_tiles,),
        in_specs=[
            # activations: one contiguous block per grid step, auto double-buffered
            pl.BlockSpec((None, D_IN, tile_sub, LANES), lambda i: (i, 0, 0, 0)),
            # weights / biases: tiny, SMEM-resident across all grid steps
            smem, smem, smem, smem, smem, smem,
        ],
        out_specs=pl.BlockSpec((None, tile_sub, LANES), lambda i: (i, 0, 0)),
        compiler_params=pltpu.CompilerParams(
            dimension_semantics=("parallel",),   # v7x: shard batch tiles over 2 TCs
            vmem_limit_bytes=vmem_limit,         # derived from tile; fits all gens
        ),
    )(s_t, w1, b1, w2, b2, w3, b3)

    # Undo layout plumbing: [n_tiles, tile_sub, 128] -> [B, 1]
    return out.reshape(B_pad)[:B].reshape(B, 1)


nn_critic_forward_jit = jax.jit(nn_critic_forward)


def _xavier_uniform(key, fan_in, fan_out):
    # Matches torch.nn.init.xavier_uniform_ (gain=1); stored as [in, out].
    bound = (6.0 / (fan_in + fan_out)) ** 0.5
    return jax.random.uniform(
        key, (fan_in, fan_out), dtype=jnp.float32, minval=-bound, maxval=bound
    )


def init_params(key):
    k1, k2, k3 = jax.random.split(key, 3)
    w1 = _xavier_uniform(k1, D_IN, D_H1)
    b1 = jnp.full((D_H1,), 0.01, dtype=jnp.float32)   # m.bias.data.fill_(0.01)
    w2 = _xavier_uniform(k2, D_H1, D_H2)
    b2 = jnp.full((D_H2,), 0.01, dtype=jnp.float32)
    w3 = _xavier_uniform(k3, D_H2, D_OUT)
    b3 = jnp.full((D_OUT,), 0.01, dtype=jnp.float32)
    return (w1, b1, w2, b2, w3, b3)


def _reference(s, params):
    w1, b1, w2, b2, w3, b3 = params
    h1 = jnp.maximum(s @ w1 + b1, 0.0)
    h2 = jnp.maximum(h1 @ w2 + b2, 0.0)
    return h2 @ w3 + b3


if __name__ == "__main__":
    key = jax.random.PRNGKey(0)
    k_params, k_s1, k_s2 = jax.random.split(key, 3)

    params = init_params(k_params)

    # Batch of 8 CartPole-like observations (dim 4).
    s_small = jax.random.normal(k_s1, (8, 4), dtype=jnp.float32)
    v_small = jax.block_until_ready(nn_critic_forward_jit(s_small, params))
    assert v_small.shape == (8, 1)
    assert jnp.allclose(v_small, _reference(s_small, params), atol=1e-5, rtol=1e-5)

    # Larger, non-multiple-of-tile batch: exercises tail padding, 2-way grid
    # (v7x even split), and the in-kernel strip loop.
    s_big = jax.random.normal(k_s2, (3000, 4), dtype=jnp.float32)
    v_big = jax.block_until_ready(nn_critic_forward_jit(s_big, params))
    assert v_big.shape == (3000, 1)
    assert jnp.allclose(v_big, _reference(s_big, params), atol=1e-4, rtol=1e-4)

    print("KERNEL_OK")
</pallas_src>

<mosaic_0001>
module attributes {stable_mosaic.version = 11 : i64} {
  func.func @_critic_kernel(%arg0: i32, %arg1: memref<1x4x8x128xf32, #tpu.memory_space<vmem>>, %arg2: memref<4x8xf32, #tpu.memory_space<smem>>, %arg3: memref<8xf32, #tpu.memory_space<smem>>, %arg4: memref<8x4xf32, #tpu.memory_space<smem>>, %arg5: memref<4xf32, #tpu.memory_space<smem>>, %arg6: memref<4x1xf32, #tpu.memory_space<smem>>, %arg7: memref<1xf32, #tpu.memory_space<smem>>, %arg8: memref<1x8x128xf32, #tpu.memory_space<vmem>>) attributes {dimension_semantics = [#tpu.dimension_semantics<parallel>], iteration_bounds = array<i64: 1>, scalar_prefetch = 0 : i64, scratch_operands = 0 : i64, tpu.core_type = #tpu.core_type<tc>, window_params = [{transform_indices = @transform_0, window_bounds = array<i64: 1, 4, 8, 128>}, {transform_indices = @transform_1, window_bounds = array<i64: 4, 8>}, {transform_indices = @transform_2, window_bounds = array<i64: 8>}, {transform_indices = @transform_3, window_bounds = array<i64: 8, 4>}, {transform_indices = @transform_4, window_bounds = array<i64: 4>}, {transform_indices = @transform_5, window_bounds = array<i64: 4, 1>}, {transform_indices = @transform_6, window_bounds = array<i64: 1>}, {transform_indices = @transform_7, window_bounds = array<i64: 1, 8, 128>}]} {
    %c0 = arith.constant 0 : index
    %c0_0 = arith.constant 0 : index
    %0 = memref.load %arg2[%c0, %c0_0] : memref<4x8xf32, #tpu.memory_space<smem>>
    %c0_1 = arith.constant 0 : index
    %c1 = arith.constant 1 : index
    %1 = memref.load %arg2[%c0_1, %c1] : memref<4x8xf32, #tpu.memory_space<smem>>
    %c0_2 = arith.constant 0 : index
    %c2 = arith.constant 2 : index
    %2 = memref.load %arg2[%c0_2, %c2] : memref<4x8xf32, #tpu.memory_space<smem>>
    %c0_3 = arith.constant 0 : index
    %c3 = arith.constant 3 : index
    %3 = memref.load %arg2[%c0_3, %c3] : memref<4x8xf32, #tpu.memory_space<smem>>
    %c0_4 = arith.constant 0 : index
    %c4 = arith.constant 4 : index
    %4 = memref.load %arg2[%c0_4, %c4] : memref<4x8xf32, #tpu.memory_space<smem>>
    %c0_5 = arith.constant 0 : index
    %c5 = arith.constant 5 : index
    %5 = memref.load %arg2[%c0_5, %c5] : memref<4x8xf32, #tpu.memory_space<smem>>
    %c0_6 = arith.constant 0 : index
    %c6 = arith.constant 6 : index
    %6 = memref.load %arg2[%c0_6, %c6] : memref<4x8xf32, #tpu.memory_space<smem>>
    %c0_7 = arith.constant 0 : index
    %c7 = arith.constant 7 : index
    %7 = memref.load %arg2[%c0_7, %c7] : memref<4x8xf32, #tpu.memory_space<smem>>
    %c1_8 = arith.constant 1 : index
    %c0_9 = arith.constant 0 : index
    %8 = memref.load %arg2[%c1_8, %c0_9] : memref<4x8xf32, #tpu.memory_space<smem>>
    %c1_10 = arith.constant 1 : index
    %c1_11 = arith.constant 1 : index
    %9 = memref.load %arg2[%c1_10, %c1_11] : memref<4x8xf32, #tpu.memory_space<smem>>
    %c1_12 = arith.constant 1 : index
    %c2_13 = arith.constant 2 : index
    %10 = memref.load %arg2[%c1_12, %c2_13] : memref<4x8xf32, #tpu.memory_space<smem>>
    %c1_14 = arith.constant 1 : index
    %c3_15 = arith.constant 3 : index
    %11 = memref.load %arg2[%c1_14, %c3_15] : memref<4x8xf32, #tpu.memory_space<smem>>
    %c1_16 = arith.constant 1 : index
    %c4_17 = arith.constant 4 : index
    %12 = memref.load %arg2[%c1_16, %c4_17] : memref<4x8xf32, #tpu.memory_space<smem>>
    %c1_18 = arith.constant 1 : index
    %c5_19 = arith.constant 5 : index
    %13 = memref.load %arg2[%c1_18, %c5_19] : memref<4x8xf32, #tpu.memory_space<smem>>
    %c1_20 = arith.constant 1 : index
    %c6_21 = arith.constant 6 : index
    %14 = memref.load %arg2[%c1_20, %c6_21] : memref<4x8xf32, #tpu.memory_space<smem>>
    %c1_22 = arith.constant 1 : index
    %c7_23 = arith.constant 7 : index
    %15 = memref.load %arg2[%c1_22, %c7_23] : memref<4x8xf32, #tpu.memory_space<smem>>
    %c2_24 = arith.constant 2 : index
    %c0_25 = arith.constant 0 : index
    %16 = memref.load %arg2[%c2_24, %c0_25] : memref<4x8xf32, #tpu.memory_space<smem>>
    %c2_26 = arith.constant 2 : index
    %c1_27 = arith.constant 1 : index
    %17 = memref.load %arg2[%c2_26, %c1_27] : memref<4x8xf32, #tpu.memory_space<smem>>
    %c2_28 = arith.constant 2 : index
    %c2_29 = arith.constant 2 : index
    %18 = memref.load %arg2[%c2_28, %c2_29] : memref<4x8xf32, #tpu.memory_space<smem>>
    %c2_30 = arith.constant 2 : index
    %c3_31 = arith.constant 3 : index
    %19 = memref.load %arg2[%c2_30, %c3_31] : memref<4x8xf32, #tpu.memory_space<smem>>
    %c2_32 = arith.constant 2 : index
    %c4_33 = arith.constant 4 : index
    %20 = memref.load %arg2[%c2_32, %c4_33] : memref<4x8xf32, #tpu.memory_space<smem>>
    %c2_34 = arith.constant 2 : index
    %c5_35 = arith.constant 5 : index
    %21 = memref.load %arg2[%c2_34, %c5_35] : memref<4x8xf32, #tpu.memory_space<smem>>
    %c2_36 = arith.constant 2 : index
    %c6_37 = arith.constant 6 : index
    %22 = memref.load %arg2[%c2_36, %c6_37] : memref<4x8xf32, #tpu.memory_space<smem>>
    %c2_38 = arith.constant 2 : index
    %c7_39 = arith.constant 7 : index
    %23 = memref.load %arg2[%c2_38, %c7_39] : memref<4x8xf32, #tpu.memory_space<smem>>
    %c3_40 = arith.constant 3 : index
    %c0_41 = arith.constant 0 : index
    %24 = memref.load %arg2[%c3_40, %c0_41] : memref<4x8xf32, #tpu.memory_space<smem>>
    %c3_42 = arith.constant 3 : index
    %c1_43 = arith.constant 1 : index
    %25 = memref.load %arg2[%c3_42, %c1_43] : memref<4x8xf32, #tpu.memory_space<smem>>
    %c3_44 = arith.constant 3 : index
    %c2_45 = arith.constant 2 : index
    %26 = memref.load %arg2[%c3_44, %c2_45] : memref<4x8xf32, #tpu.memory_space<smem>>
    %c3_46 = arith.constant 3 : index
    %c3_47 = arith.constant 3 : index
    %27 = memref.load %arg2[%c3_46, %c3_47] : memref<4x8xf32, #tpu.memory_space<smem>>
    %c3_48 = arith.constant 3 : index
    %c4_49 = arith.constant 4 : index
    %28 = memref.load %arg2[%c3_48, %c4_49] : memref<4x8xf32, #tpu.memory_space<smem>>
    %c3_50 = arith.constant 3 : index
    %c5_51 = arith.constant 5 : index
    %29 = memref.load %arg2[%c3_50, %c5_51] : memref<4x8xf32, #tpu.memory_space<smem>>
    %c3_52 = arith.constant 3 : index
    %c6_53 = arith.constant 6 : index
    %30 = memref.load %arg2[%c3_52, %c6_53] : memref<4x8xf32, #tpu.memory_space<smem>>
    %c3_54 = arith.constant 3 : index
    %c7_55 = arith.constant 7 : index
    %31 = memref.load %arg2[%c3_54, %c7_55] : memref<4x8xf32, #tpu.memory_space<smem>>
    %c0_56 = arith.constant 0 : index
    %32 = memref.load %arg3[%c0_56] : memref<8xf32, #tpu.memory_space<smem>>
    %c1_57 = arith.constant 1 : index
    %33 = memref.load %arg3[%c1_57] : memref<8xf32, #tpu.memory_space<smem>>
    %c2_58 = arith.constant 2 : index
    %34 = memref.load %arg3[%c2_58] : memref<8xf32, #tpu.memory_space<smem>>
    %c3_59 = arith.constant 3 : index
    %35 = memref.load %arg3[%c3_59] : memref<8xf32, #tpu.memory_space<smem>>
    %c4_60 = arith.constant 4 : index
    %36 = memref.load %arg3[%c4_60] : memref<8xf32, #tpu.memory_space<smem>>
    %c5_61 = arith.constant 5 : index
    %37 = memref.load %arg3[%c5_61] : memref<8xf32, #tpu.memory_space<smem>>
    %c6_62 = arith.constant 6 : index
    %38 = memref.load %arg3[%c6_62] : memref<8xf32, #tpu.memory_space<smem>>
    %c7_63 = arith.constant 7 : index
    %39 = memref.load %arg3[%c7_63] : memref<8xf32, #tpu.memory_space<smem>>
    %c0_64 = arith.constant 0 : index
    %c0_65 = arith.constant 0 : index
    %40 = memref.load %arg4[%c0_64, %c0_65] : memref<8x4xf32, #tpu.memory_space<smem>>
    %c0_66 = arith.constant 0 : index
    %c1_67 = arith.constant 1 : index
    %41 = memref.load %arg4[%c0_66, %c1_67] : memref<8x4xf32, #tpu.memory_space<smem>>
    %c0_68 = arith.constant 0 : index
    %c2_69 = arith.constant 2 : index
    %42 = memref.load %arg4[%c0_68, %c2_69] : memref<8x4xf32, #tpu.memory_space<smem>>
    %c0_70 = arith.constant 0 : index
    %c3_71 = arith.constant 3 : index
    %43 = memref.load %arg4[%c0_70, %c3_71] : memref<8x4xf32, #tpu.memory_space<smem>>
    %c1_72 = arith.constant 1 : index
    %c0_73 = arith.constant 0 : index
    %44 = memref.load %arg4[%c1_72, %c0_73] : memref<8x4xf32, #tpu.memory_space<smem>>
    %c1_74 = arith.constant 1 : index
    %c1_75 = arith.constant 1 : index
    %45 = memref.load %arg4[%c1_74, %c1_75] : memref<8x4xf32, #tpu.memory_space<smem>>
    %c1_76 = arith.constant 1 : index
    %c2_77 = arith.constant 2 : index
    %46 = memref.load %arg4[%c1_76, %c2_77] : memref<8x4xf32, #tpu.memory_space<smem>>
    %c1_78 = arith.constant 1 : index
    %c3_79 = arith.constant 3 : index
    %47 = memref.load %arg4[%c1_78, %c3_79] : memref<8x4xf32, #tpu.memory_space<smem>>
    %c2_80 = arith.constant 2 : index
    %c0_81 = arith.constant 0 : index
    %48 = memref.load %arg4[%c2_80, %c0_81] : memref<8x4xf32, #tpu.memory_space<smem>>
    %c2_82 = arith.constant 2 : index
    %c1_83 = arith.constant 1 : index
    %49 = memref.load %arg4[%c2_82, %c1_83] : memref<8x4xf32, #tpu.memory_space<smem>>
    %c2_84 = arith.constant 2 : index
    %c2_85 = arith.constant 2 : index
    %50 = memref.load %arg4[%c2_84, %c2_85] : memref<8x4xf32, #tpu.memory_space<smem>>
    %c2_86 = arith.constant 2 : index
    %c3_87 = arith.constant 3 : index
    %51 = memref.load %arg4[%c2_86, %c3_87] : memref<8x4xf32, #tpu.memory_space<smem>>
    %c3_88 = arith.constant 3 : index
    %c0_89 = arith.constant 0 : index
    %52 = memref.load %arg4[%c3_88, %c0_89] : memref<8x4xf32, #tpu.memory_space<smem>>
    %c3_90 = arith.constant 3 : index
    %c1_91 = arith.constant 1 : index
    %53 = memref.load %arg4[%c3_90, %c1_91] : memref<8x4xf32, #tpu.memory_space<smem>>
    %c3_92 = arith.constant 3 : index
    %c2_93 = arith.constant 2 : index
    %54 = memref.load %arg4[%c3_92, %c2_93] : memref<8x4xf32, #tpu.memory_space<smem>>
    %c3_94 = arith.constant 3 : index
    %c3_95 = arith.constant 3 : index
    %55 = memref.load %arg4[%c3_94, %c3_95] : memref<8x4xf32, #tpu.memory_space<smem>>
    %c4_96 = arith.constant 4 : index
    %c0_97 = arith.constant 0 : index
    %56 = memref.load %arg4[%c4_96, %c0_97] : memref<8x4xf32, #tpu.memory_space<smem>>
    %c4_98 = arith.constant 4 : index
    %c1_99 = arith.constant 1 : index
    %57 = memref.load %arg4[%c4_98, %c1_99] : memref<8x4xf32, #tpu.memory_space<smem>>
    %c4_100 = arith.constant 4 : index
    %c2_101 = arith.constant 2 : index
    %58 = memref.load %arg4[%c4_100, %c2_101] : memref<8x4xf32, #tpu.memory_space<smem>>
    %c4_102 = arith.constant 4 : index
    %c3_103 = arith.constant 3 : index
    %59 = memref.load %arg4[%c4_102, %c3_103] : memref<8x4xf32, #tpu.memory_space<smem>>
    %c5_104 = arith.constant 5 : index
    %c0_105 = arith.constant 0 : index
    %60 = memref.load %arg4[%c5_104, %c0_105] : memref<8x4xf32, #tpu.memory_space<smem>>
    %c5_106 = arith.constant 5 : index
    %c1_107 = arith.constant 1 : index
    %61 = memref.load %arg4[%c5_106, %c1_107] : memref<8x4xf32, #tpu.memory_space<smem>>
    %c5_108 = arith.constant 5 : index
    %c2_109 = arith.constant 2 : index
    %62 = memref.load %arg4[%c5_108, %c2_109] : memref<8x4xf32, #tpu.memory_space<smem>>
    %c5_110 = arith.constant 5 : index
    %c3_111 = arith.constant 3 : index
    %63 = memref.load %arg4[%c5_110, %c3_111] : memref<8x4xf32, #tpu.memory_space<smem>>
    %c6_112 = arith.constant 6 : index
    %c0_113 = arith.constant 0 : index
    %64 = memref.load %arg4[%c6_112, %c0_113] : memref<8x4xf32, #tpu.memory_space<smem>>
    %c6_114 = arith.constant 6 : index
    %c1_115 = arith.constant 1 : index
    %65 = memref.load %arg4[%c6_114, %c1_115] : memref<8x4xf32, #tpu.memory_space<smem>>
    %c6_116 = arith.constant 6 : index
    %c2_117 = arith.constant 2 : index
    %66 = memref.load %arg4[%c6_116, %c2_117] : memref<8x4xf32, #tpu.memory_space<smem>>
    %c6_118 = arith.constant 6 : index
    %c3_119 = arith.constant 3 : index
    %67 = memref.load %arg4[%c6_118, %c3_119] : memref<8x4xf32, #tpu.memory_space<smem>>
    %c7_120 = arith.constant 7 : index
    %c0_121 = arith.constant 0 : index
    %68 = memref.load %arg4[%c7_120, %c0_121] : memref<8x4xf32, #tpu.memory_space<smem>>
    %c7_122 = arith.constant 7 : index
    %c1_123 = arith.constant 1 : index
    %69 = memref.load %arg4[%c7_122, %c1_123] : memref<8x4xf32, #tpu.memory_space<smem>>
    %c7_124 = arith.constant 7 : index
    %c2_125 = arith.constant 2 : index
    %70 = memref.load %arg4[%c7_124, %c2_125] : memref<8x4xf32, #tpu.memory_space<smem>>
    %c7_126 = arith.constant 7 : index
    %c3_127 = arith.constant 3 : index
    %71 = memref.load %arg4[%c7_126, %c3_127] : memref<8x4xf32, #tpu.memory_space<smem>>
    %c0_128 = arith.constant 0 : index
    %72 = memref.load %arg5[%c0_128] : memref<4xf32, #tpu.memory_space<smem>>
    %c1_129 = arith.constant 1 : index
    %73 = memref.load %arg5[%c1_129] : memref<4xf32, #tpu.memory_space<smem>>
    %c2_130 = arith.constant 2 : index
    %74 = memref.load %arg5[%c2_130] : memref<4xf32, #tpu.memory_space<smem>>
    %c3_131 = arith.constant 3 : index
    %75 = memref.load %arg5[%c3_131] : memref<4xf32, #tpu.memory_space<smem>>
    %c0_132 = arith.constant 0 : index
    %c0_133 = arith.constant 0 : index
    %76 = memref.load %arg6[%c0_132, %c0_133] : memref<4x1xf32, #tpu.memory_space<smem>>
    %c1_134 = arith.constant 1 : index
    %c0_135 = arith.constant 0 : index
    %77 = memref.load %arg6[%c1_134, %c0_135] : memref<4x1xf32, #tpu.memory_space<smem>>
    %c2_136 = arith.constant 2 : index
    %c0_137 = arith.constant 0 : index
    %78 = memref.load %arg6[%c2_136, %c0_137] : memref<4x1xf32, #tpu.memory_space<smem>>
    %c3_138 = arith.constant 3 : index
    %c0_139 = arith.constant 0 : index
    %79 = memref.load %arg6[%c3_138, %c0_139] : memref<4x1xf32, #tpu.memory_space<smem>>
    %c0_140 = arith.constant 0 : index
    %80 = memref.load %arg7[%c0_140] : memref<1xf32, #tpu.memory_space<smem>>
    %c0_i32 = arith.constant 0 : i32
    %c8_i32 = arith.constant 8 : i32
    %81 = arith.muli %c0_i32, %c8_i32 : i32
    %82 = tpu.assume_multiple %81, 8 : i32
    %c0_141 = arith.constant 0 : index
    %c0_142 = arith.constant 0 : index
    %83 = arith.index_cast %82 : i32 to index
    %c0_143 = arith.constant 0 : index
    %84 = vector.load %arg1[%c0_141, %c0_142, %83, %c0_143] : memref<1x4x8x128xf32, #tpu.memory_space<vmem>>, vector<1x1x8x128xf32>
    %85 = vector.shape_cast %84 : vector<1x1x8x128xf32> to vector<8x128xf32>
    %c0_144 = arith.constant 0 : index
    %c1_145 = arith.constant 1 : index
    %86 = arith.index_cast %82 : i32 to index
    %c0_146 = arith.constant 0 : index
    %87 = vector.load %arg1[%c0_144, %c1_145, %86, %c0_146] : memref<1x4x8x128xf32, #tpu.memory_space<vmem>>, vector<1x1x8x128xf32>
    %88 = vector.shape_cast %87 : vector<1x1x8x128xf32> to vector<8x128xf32>
    %c0_147 = arith.constant 0 : index
    %c2_148 = arith.constant 2 : index
    %89 = arith.index_cast %82 : i32 to index
    %c0_149 = arith.constant 0 : index
    %90 = vector.load %arg1[%c0_147, %c2_148, %89, %c0_149] : memref<1x4x8x128xf32, #tpu.memory_space<vmem>>, vector<1x1x8x128xf32>
    %91 = vector.shape_cast %90 : vector<1x1x8x128xf32> to vector<8x128xf32>
    %c0_150 = arith.constant 0 : index
    %c3_151 = arith.constant 3 : index
    %92 = arith.index_cast %82 : i32 to index
    %c0_152 = arith.constant 0 : index
    %93 = vector.load %arg1[%c0_150, %c3_151, %92, %c0_152] : memref<1x4x8x128xf32, #tpu.memory_space<vmem>>, vector<1x1x8x128xf32>
    %94 = vector.shape_cast %93 : vector<1x1x8x128xf32> to vector<8x128xf32>
    %95 = vector.broadcast %0 : f32 to vector<8x128xf32>
    %96 = arith.mulf %95, %85 : vector<8x128xf32>
    %97 = vector.broadcast %8 : f32 to vector<8x128xf32>
    %98 = arith.mulf %97, %88 : vector<8x128xf32>
    %99 = arith.addf %96, %98 : vector<8x128xf32>
    %100 = vector.broadcast %16 : f32 to vector<8x128xf32>
    %101 = arith.mulf %100, %91 : vector<8x128xf32>
    %102 = arith.addf %99, %101 : vector<8x128xf32>
    %103 = vector.broadcast %24 : f32 to vector<8x128xf32>
    %104 = arith.mulf %103, %94 : vector<8x128xf32>
    %105 = arith.addf %102, %104 : vector<8x128xf32>
    %106 = vector.broadcast %32 : f32 to vector<8x128xf32>
    %107 = arith.addf %105, %106 : vector<8x128xf32>
    %cst = arith.constant 0.000000e+00 : f32
    %108 = vector.broadcast %cst : f32 to vector<8x128xf32>
    %109 = arith.maximumf %107, %108 : vector<8x128xf32>
    %110 = vector.broadcast %1 : f32 to vector<8x128xf32>
    %111 = arith.mulf %110, %85 : vector<8x128xf32>
    %112 = vector.broadcast %9 : f32 to vector<8x128xf32>
    %113 = arith.mulf %112, %88 : vector<8x128xf32>
    %114 = arith.addf %111, %113 : vector<8x128xf32>
    %115 = vector.broadcast %17 : f32 to vector<8x128xf32>
    %116 = arith.mulf %115, %91 : vector<8x128xf32>
    %117 = arith.addf %114, %116 : vector<8x128xf32>
    %118 = vector.broadcast %25 : f32 to vector<8x128xf32>
    %119 = arith.mulf %118, %94 : vector<8x128xf32>
    %120 = arith.addf %117, %119 : vector<8x128xf32>
    %121 = vector.broadcast %33 : f32 to vector<8x128xf32>
    %122 = arith.addf %120, %121 : vector<8x128xf32>
    %cst_153 = arith.constant 0.000000e+00 : f32
    %123 = vector.broadcast %cst_153 : f32 to vector<8x128xf32>
    %124 = arith.maximumf %122, %123 : vector<8x128xf32>
    %125 = vector.broadcast %2 : f32 to vector<8x128xf32>
    %126 = arith.mulf %125, %85 : vector<8x128xf32>
    %127 = vector.broadcast %10 : f32 to vector<8x128xf32>
    %128 = arith.mulf %127, %88 : vector<8x128xf32>
    %129 = arith.addf %126, %128 : vector<8x128xf32>
    %130 = vector.broadcast %18 : f32 to vector<8x128xf32>
    %131 = arith.mulf %130, %91 : vector<8x128xf32>
    %132 = arith.addf %129, %131 : vector<8x128xf32>
    %133 = vector.broadcast %26 : f32 to vector<8x128xf32>
    %134 = arith.mulf %133, %94 : vector<8x128xf32>
    %135 = arith.addf %132, %134 : vector<8x128xf32>
    %136 = vector.broadcast %34 : f32 to vector<8x128xf32>
    %137 = arith.addf %135, %136 : vector<8x128xf32>
    %cst_154 = arith.constant 0.000000e+00 : f32
    %138 = vector.broadcast %cst_154 : f32 to vector<8x128xf32>
    %139 = arith.maximumf %137, %138 : vector<8x128xf32>
    %140 = vector.broadcast %3 : f32 to vector<8x128xf32>
    %141 = arith.mulf %140, %85 : vector<8x128xf32>
    %142 = vector.broadcast %11 : f32 to vector<8x128xf32>
    %143 = arith.mulf %142, %88 : vector<8x128xf32>
    %144 = arith.addf %141, %143 : vector<8x128xf32>
    %145 = vector.broadcast %19 : f32 to vector<8x128xf32>
    %146 = arith.mulf %145, %91 : vector<8x128xf32>
    %147 = arith.addf %144, %146 : vector<8x128xf32>
    %148 = vector.broadcast %27 : f32 to vector<8x128xf32>
    %149 = arith.mulf %148, %94 : vector<8x128xf32>
    %150 = arith.addf %147, %149 : vector<8x128xf32>
    %151 = vector.broadcast %35 : f32 to vector<8x128xf32>
    %152 = arith.addf %150, %151 : vector<8x128xf32>
    %cst_155 = arith.constant 0.000000e+00 : f32
    %153 = vector.broadcast %cst_155 : f32 to vector<8x128xf32>
    %154 = arith.maximumf %152, %153 : vector<8x128xf32>
    %155 = vector.broadcast %4 : f32 to vector<8x128xf32>
    %156 = arith.mulf %155, %85 : vector<8x128xf32>
    %157 = vector.broadcast %12 : f32 to vector<8x128xf32>
    %158 = arith.mulf %157, %88 : vector<8x128xf32>
    %159 = arith.addf %156, %158 : vector<8x128xf32>
    %160 = vector.broadcast %20 : f32 to vector<8x128xf32>
    %161 = arith.mulf %160, %91 : vector<8x128xf32>
    %162 = arith.addf %159, %161 : vector<8x128xf32>
    %163 = vector.broadcast %28 : f32 to vector<8x128xf32>
    %164 = arith.mulf %163, %94 : vector<8x128xf32>
    %165 = arith.addf %162, %164 : vector<8x128xf32>
    %166 = vector.broadcast %36 : f32 to vector<8x128xf32>
    %167 = arith.addf %165, %166 : vector<8x128xf32>
    %cst_156 = arith.constant 0.000000e+00 : f32
    %168 = vector.broadcast %cst_156 : f32 to vector<8x128xf32>
    %169 = arith.maximumf %167, %168 : vector<8x128xf32>
    %170 = vector.broadcast %5 : f32 to vector<8x128xf32>
    %171 = arith.mulf %170, %85 : vector<8x128xf32>
    %172 = vector.broadcast %13 : f32 to vector<8x128xf32>
    %173 = arith.mulf %172, %88 : vector<8x128xf32>
    %174 = arith.addf %171, %173 : vector<8x128xf32>
    %175 = vector.broadcast %21 : f32 to vector<8x128xf32>
    %176 = arith.mulf %175, %91 : vector<8x128xf32>
    %177 = arith.addf %174, %176 : vector<8x128xf32>
    %178 = vector.broadcast %29 : f32 to vector<8x128xf32>
    %179 = arith.mulf %178, %94 : vector<8x128xf32>
    %180 = arith.addf %177, %179 : vector<8x128xf32>
    %181 = vector.broadcast %37 : f32 to vector<8x128xf32>
    %182 = arith.addf %180, %181 : vector<8x128xf32>
    %cst_157 = arith.constant 0.000000e+00 : f32
    %183 = vector.broadcast %cst_157 : f32 to vector<8x128xf32>
    %184 = arith.maximumf %182, %183 : vector<8x128xf32>
    %185 = vector.broadcast %6 : f32 to vector<8x128xf32>
    %186 = arith.mulf %185, %85 : vector<8x128xf32>
    %187 = vector.broadcast %14 : f32 to vector<8x128xf32>
    %188 = arith.mulf %187, %88 : vector<8x128xf32>
    %189 = arith.addf %186, %188 : vector<8x128xf32>
    %190 = vector.broadcast %22 : f32 to vector<8x128xf32>
    %191 = arith.mulf %190, %91 : vector<8x128xf32>
    %192 = arith.addf %189, %191 : vector<8x128xf32>
    %193 = vector.broadcast %30 : f32 to vector<8x128xf32>
    %194 = arith.mulf %193, %94 : vector<8x128xf32>
    %195 = arith.addf %192, %194 : vector<8x128xf32>
    %196 = vector.broadcast %38 : f32 to vector<8x128xf32>
    %197 = arith.addf %195, %196 : vector<8x128xf32>
    %cst_158 = arith.constant 0.000000e+00 : f32
    %198 = vector.broadcast %cst_158 : f32 to vector<8x128xf32>
    %199 = arith.maximumf %197, %198 : vector<8x128xf32>
    %200 = vector.broadcast %7 : f32 to vector<8x128xf32>
    %201 = arith.mulf %200, %85 : vector<8x128xf32>
    %202 = vector.broadcast %15 : f32 to vector<8x128xf32>
    %203 = arith.mulf %202, %88 : vector<8x128xf32>
    %204 = arith.addf %201, %203 : vector<8x128xf32>
    %205 = vector.broadcast %23 : f32 to vector<8x128xf32>
    %206 = arith.mulf %205, %91 : vector<8x128xf32>
    %207 = arith.addf %204, %206 : vector<8x128xf32>
    %208 = vector.broadcast %31 : f32 to vector<8x128xf32>
    %209 = arith.mulf %208, %94 : vector<8x128xf32>
    %210 = arith.addf %207, %209 : vector<8x128xf32>
    %211 = vector.broadcast %39 : f32 to vector<8x128xf32>
    %212 = arith.addf %210, %211 : vector<8x128xf32>
    %cst_159 = arith.constant 0.000000e+00 : f32
    %213 = vector.broadcast %cst_159 : f32 to vector<8x128xf32>
    %214 = arith.maximumf %212, %213 : vector<8x128xf32>
    %215 = vector.broadcast %40 : f32 to vector<8x128xf32>
    %216 = arith.mulf %215, %109 : vector<8x128xf32>
    %217 = vector.broadcast %44 : f32 to vector<8x128xf32>
    %218 = arith.mulf %217, %124 : vector<8x128xf32>
    %219 = arith.addf %216, %218 : vector<8x128xf32>
    %220 = vector.broadcast %48 : f32 to vector<8x128xf32>
    %221 = arith.mulf %220, %139 : vector<8x128xf32>
    %222 = arith.addf %219, %221 : vector<8x128xf32>
    %223 = vector.broadcast %52 : f32 to vector<8x128xf32>
    %224 = arith.mulf %223, %154 : vector<8x128xf32>
    %225 = arith.addf %222, %224 : vector<8x128xf32>
    %226 = vector.broadcast %56 : f32 to vector<8x128xf32>
    %227 = arith.mulf %226, %169 : vector<8x128xf32>
    %228 = arith.addf %225, %227 : vector<8x128xf32>
    %229 = vector.broadcast %60 : f32 to vector<8x128xf32>
    %230 = arith.mulf %229, %184 : vector<8x128xf32>
    %231 = arith.addf %228, %230 : vector<8x128xf32>
    %232 = vector.broadcast %64 : f32 to vector<8x128xf32>
    %233 = arith.mulf %232, %199 : vector<8x128xf32>
    %234 = arith.addf %231, %233 : vector<8x128xf32>
    %235 = vector.broadcast %68 : f32 to vector<8x128xf32>
    %236 = arith.mulf %235, %214 : vector<8x128xf32>
    %237 = arith.addf %234, %236 : vector<8x128xf32>
    %238 = vector.broadcast %72 : f32 to vector<8x128xf32>
    %239 = arith.addf %237, %238 : vector<8x128xf32>
    %cst_160 = arith.constant 0.000000e+00 : f32
    %240 = vector.broadcast %cst_160 : f32 to vector<8x128xf32>
    %241 = arith.maximumf %239, %240 : vector<8x128xf32>
    %242 = vector.broadcast %41 : f32 to vector<8x128xf32>
    %243 = arith.mulf %242, %109 : vector<8x128xf32>
    %244 = vector.broadcast %45 : f32 to vector<8x128xf32>
    %245 = arith.mulf %244, %124 : vector<8x128xf32>
    %246 = arith.addf %243, %245 : vector<8x128xf32>
    %247 = vector.broadcast %49 : f32 to vector<8x128xf32>
    %248 = arith.mulf %247, %139 : vector<8x128xf32>
    %249 = arith.addf %246, %248 : vector<8x128xf32>
    %250 = vector.broadcast %53 : f32 to vector<8x128xf32>
    %251 = arith.mulf %250, %154 : vector<8x128xf32>
    %252 = arith.addf %249, %251 : vector<8x128xf32>
    %253 = vector.broadcast %57 : f32 to vector<8x128xf32>
    %254 = arith.mulf %253, %169 : vector<8x128xf32>
    %255 = arith.addf %252, %254 : vector<8x128xf32>
    %256 = vector.broadcast %61 : f32 to vector<8x128xf32>
    %257 = arith.mulf %256, %184 : vector<8x128xf32>
    %258 = arith.addf %255, %257 : vector<8x128xf32>
    %259 = vector.broadcast %65 : f32 to vector<8x128xf32>
    %260 = arith.mulf %259, %199 : vector<8x128xf32>
    %261 = arith.addf %258, %260 : vector<8x128xf32>
    %262 = vector.broadcast %69 : f32 to vector<8x128xf32>
    %263 = arith.mulf %262, %214 : vector<8x128xf32>
    %264 = arith.addf %261, %263 : vector<8x128xf32>
    %265 = vector.broadcast %73 : f32 to vector<8x128xf32>
    %266 = arith.addf %264, %265 : vector<8x128xf32>
    %cst_161 = arith.constant 0.000000e+00 : f32
    %267 = vector.broadcast %cst_161 : f32 to vector<8x128xf32>
    %268 = arith.maximumf %266, %267 : vector<8x128xf32>
    %269 = vector.broadcast %42 : f32 to vector<8x128xf32>
    %270 = arith.mulf %269, %109 : vector<8x128xf32>
    %271 = vector.broadcast %46 : f32 to vector<8x128xf32>
    %272 = arith.mulf %271, %124 : vector<8x128xf32>
    %273 = arith.addf %270, %272 : vector<8x128xf32>
    %274 = vector.broadcast %50 : f32 to vector<8x128xf32>
    %275 = arith.mulf %274, %139 : vector<8x128xf32>
    %276 = arith.addf %273, %275 : vector<8x128xf32>
    %277 = vector.broadcast %54 : f32 to vector<8x128xf32>
    %278 = arith.mulf %277, %154 : vector<8x128xf32>
    %279 = arith.addf %276, %278 : vector<8x128xf32>
    %280 = vector.broadcast %58 : f32 to vector<8x128xf32>
    %281 = arith.mulf %280, %169 : vector<8x128xf32>
    %282 = arith.addf %279, %281 : vector<8x128xf32>
    %283 = vector.broadcast %62 : f32 to vector<8x128xf32>
    %284 = arith.mulf %283, %184 : vector<8x128xf32>
    %285 = arith.addf %282, %284 : vector<8x128xf32>
    %286 = vector.broadcast %66 : f32 to vector<8x128xf32>
    %287 = arith.mulf %286, %199 : vector<8x128xf32>
    %288 = arith.addf %285, %287 : vector<8x128xf32>
    %289 = vector.broadcast %70 : f32 to vector<8x128xf32>
    %290 = arith.mulf %289, %214 : vector<8x128xf32>
    %291 = arith.addf %288, %290 : vector<8x128xf32>
    %292 = vector.broadcast %74 : f32 to vector<8x128xf32>
    %293 = arith.addf %291, %292 : vector<8x128xf32>
    %cst_162 = arith.constant 0.000000e+00 : f32
    %294 = vector.broadcast %cst_162 : f32 to vector<8x128xf32>
    %295 = arith.maximumf %293, %294 : vector<8x128xf32>
    %296 = vector.broadcast %43 : f32 to vector<8x128xf32>
    %297 = arith.mulf %296, %109 : vector<8x128xf32>
    %298 = vector.broadcast %47 : f32 to vector<8x128xf32>
    %299 = arith.mulf %298, %124 : vector<8x128xf32>
    %300 = arith.addf %297, %299 : vector<8x128xf32>
    %301 = vector.broadcast %51 : f32 to vector<8x128xf32>
    %302 = arith.mulf %301, %139 : vector<8x128xf32>
    %303 = arith.addf %300, %302 : vector<8x128xf32>
    %304 = vector.broadcast %55 : f32 to vector<8x128xf32>
    %305 = arith.mulf %304, %154 : vector<8x128xf32>
    %306 = arith.addf %303, %305 : vector<8x128xf32>
    %307 = vector.broadcast %59 : f32 to vector<8x128xf32>
    %308 = arith.mulf %307, %169 : vector<8x128xf32>
    %309 = arith.addf %306, %308 : vector<8x128xf32>
    %310 = vector.broadcast %63 : f32 to vector<8x128xf32>
    %311 = arith.mulf %310, %184 : vector<8x128xf32>
    %312 = arith.addf %309, %311 : vector<8x128xf32>
    %313 = vector.broadcast %67 : f32 to vector<8x128xf32>
    %314 = arith.mulf %313, %199 : vector<8x128xf32>
    %315 = arith.addf %312, %314 : vector<8x128xf32>
    %316 = vector.broadcast %71 : f32 to vector<8x128xf32>
    %317 = arith.mulf %316, %214 : vector<8x128xf32>
    %318 = arith.addf %315, %317 : vector<8x128xf32>
    %319 = vector.broadcast %75 : f32 to vector<8x128xf32>
    %320 = arith.addf %318, %319 : vector<8x128xf32>
    %cst_163 = arith.constant 0.000000e+00 : f32
    %321 = vector.broadcast %cst_163 : f32 to vector<8x128xf32>
    %322 = arith.maximumf %320, %321 : vector<8x128xf32>
    %323 = vector.broadcast %76 : f32 to vector<8x128xf32>
    %324 = arith.mulf %323, %241 : vector<8x128xf32>
    %325 = vector.broadcast %77 : f32 to vector<8x128xf32>
    %326 = arith.mulf %325, %268 : vector<8x128xf32>
    %327 = arith.addf %324, %326 : vector<8x128xf32>
    %328 = vector.broadcast %78 : f32 to vector<8x128xf32>
    %329 = arith.mulf %328, %295 : vector<8x128xf32>
    %330 = arith.addf %327, %329 : vector<8x128xf32>
    %331 = vector.broadcast %79 : f32 to vector<8x128xf32>
    %332 = arith.mulf %331, %322 : vector<8x128xf32>
    %333 = arith.addf %330, %332 : vector<8x128xf32>
    %334 = vector.broadcast %80 : f32 to vector<8x128xf32>
    %335 = arith.addf %333, %334 : vector<8x128xf32>
    %c0_164 = arith.constant 0 : index
    %336 = arith.index_cast %82 : i32 to index
    %c0_165 = arith.constant 0 : index
    %337 = vector.load %arg8[%c0_164, %336, %c0_165] : memref<1x8x128xf32, #tpu.memory_space<vmem>>, vector<1x8x128xf32>
    %338 = vector.shape_cast %337 : vector<1x8x128xf32> to vector<8x128xf32>
    %339 = vector.shape_cast %335 : vector<8x128xf32> to vector<1x8x128xf32>
    tpu.vector_store %arg8[%c0_164, %336, %c0_165], %339 {strides = array<i32>} : memref<1x8x128xf32, #tpu.memory_space<vmem>>, vector<1x8x128xf32>,
    %c1_i32 = arith.constant 1 : i32
    return
  }
  func.func @transform_0(%arg0: i32) -> (i32, i32, i32, i32) {
    %c0_i32 = arith.constant 0 : i32
    %c0_i32_0 = arith.constant 0 : i32
    %c0_i32_1 = arith.constant 0 : i32
    %c0_i32_2 = arith.constant 0 : i32
    return %arg0, %c0_i32, %c0_i32_0, %c0_i32_1 : i32, i32, i32, i32
  }
  func.func @transform_1(%arg0: i32) -> (i32, i32) {
    %c0_i32 = arith.constant 0 : i32
    %c0_i32_0 = arith.constant 0 : i32
    %c0_i32_1 = arith.constant 0 : i32
    return %c0_i32, %c0_i32_0 : i32, i32
  }
  func.func @transform_2(%arg0: i32) -> i32 {
    %c0_i32 = arith.constant 0 : i32
    %c0_i32_0 = arith.constant 0 : i32
    return %c0_i32 : i32
  }
  func.func @transform_3(%arg0: i32) -> (i32, i32) {
    %c0_i32 = arith.constant 0 : i32
    %c0_i32_0 = arith.constant 0 : i32
    %c0_i32_1 = arith.constant 0 : i32
    return %c0_i32, %c0_i32_0 : i32, i32
  }
  func.func @transform_4(%arg0: i32) -> i32 {
    %c0_i32 = arith.constant 0 : i32
    %c0_i32_0 = arith.constant 0 : i32
    return %c0_i32 : i32
  }
  func.func @transform_5(%arg0: i32) -> (i32, i32) {
    %c0_i32 = arith.constant 0 : i32
    %c0_i32_0 = arith.constant 0 : i32
    %c0_i32_1 = arith.constant 0 : i32
    return %c0_i32, %c0_i32_0 : i32, i32
  }
  func.func @transform_6(%arg0: i32) -> i32 {
    %c0_i32 = arith.constant 0 : i32
    %c0_i32_0 = arith.constant 0 : i32
    return %c0_i32 : i32
  }
  func.func @transform_7(%arg0: i32) -> (i32, i32, i32) {
    %c0_i32 = arith.constant 0 : i32
    %c0_i32_0 = arith.constant 0 : i32
    %c0_i32_1 = arith.constant 0 : i32
    return %arg0, %c0_i32, %c0_i32_0 : i32, i32, i32
  }
}

</mosaic_0001>

<bundles_post_ra>
// kernel: nn_critic_forward.1
= control target key start
LH: loop header
LB: loop body
LE: loop exit
PB: predicated region body
PF: predicated region fallthrough
CT: control target
= control target key end

     0   :  { %13 = vsyncpa [#allocation4], 0  ;;  %s944_s0 = inlined_call_operand.vmem [shape: f32[1,4,8,128], index: 0, kind: input, shape index: {}]   ;;  %s945_s1 = inlined_call_operand.vmem [shape: f32[4,8], index: 1, kind: input, shape index: {}]   ;;  %s946_s2 = inlined_call_operand.vmem [shape: f32[8], index: 2, kind: input, shape index: {}]   ;;  %s947_s3 = inlined_call_operand.vmem [shape: f32[8,4], index: 3, kind: input, shape index: {}]   ;;  %s948_s4 = inlined_call_operand.vmem [shape: f32[4], index: 4, kind: input, shape index: {}]   ;;  %s949_s5 = inlined_call_operand.vmem [shape: f32[4,1], index: 5, kind: input, shape index: {}]   ;;  %s950_s6 = inlined_call_operand.<no memory space> [shape: f32[1], index: 6, kind: input, shape index: {}]   ;;  %s951_s7 = inlined_call_operand.vmem [shape: f32[1,8,128], index: 7, kind: output, shape index: {}]  }
   0x1   :  { %14 = vsyncpa [#allocation6], 0  ;;  %s34_s26 = sshll.u32 %s946_s2, 4  ;;  %s35_s26 = int_to_ptr.vmem [resolvable:$true] %s34_s26 }
   0x2   :  { %15 = vsyncpa [#allocation9], 0  ;;  %s54_s29 = sshll.u32 %s948_s4, 4  ;;  %s500_s30 = scalar_lea.vmem %s35_s26, 16  ;;  %s55_s29 = int_to_ptr.vmem [resolvable:$true] %s54_s29 }
   0x3   :  { %p501_p0 = scmp.ne.s32.totalorder %s35_s26, %s500_s30  ;;  %p505_p1 = scmp.lt.s32.totalorder %s35_s26, %s35_s26 }
   0x4   :  { %p506_p2 = scmp.lt.s32.totalorder %s500_s30, %s500_s30 }
   0x6   :  { %p507_p3 = por %p506_p2, %p505_p1 }
   0x8   :  { %p508_p4 = pnand %p507_p3, %p501_p0 }
   0xa   :  { %511 = shalt.err (!%p508_p4)
}
   0xb   :  { %s566_s8 = smov [#allocation5]   ;;  %s512_s9 = scalar_lea.vmem %s55_s29, 16 }
   0xc   :  { %37 = dma.vmem_to_smem %s35_s26, 16, %s566_s8, [#allocation6]  }
   0xd   :  { %p513_p5 = scmp.ne.s32.totalorder %s55_s29, %s512_s9  ;;  %p517_p6 = scmp.lt.s32.totalorder %s55_s29, %s55_s29 }
   0xe   :  { %p518_p7 = scmp.lt.s32.totalorder %s512_s9, %s512_s9 }
  0x10   :  { %p519_p8 = por %p518_p7, %p517_p6 }
  0x12   :  { %p520_p9 = pnand %p519_p8, %p513_p5 }
  0x14   :  { %523 = shalt.err (!%p520_p9)
}
  0x15   :  { %s567_s2 = smov [#allocation8]   ;;  %s24_s11 = sshll.u32 %s945_s1, 4  ;;  %s25_s11 = int_to_ptr.vmem [resolvable:$true] %s24_s11 }
  0x16   :  { %57 = dma.vmem_to_smem %s55_s29, 16, %s567_s2, [#allocation9]  }
  0x17   :  { %s44_s14 = sshll.u32 %s947_s3, 4  ;;  %s524_s15 = scalar_lea.vmem %s25_s11, 64  ;;  %s45_s14 = int_to_ptr.vmem [resolvable:$true] %s44_s14 }
  0x18   :  { %p525_p10 = scmp.ne.s32.totalorder %s25_s11, %s524_s15  ;;  %p529_p11 = scmp.lt.s32.totalorder %s25_s11, %s25_s11 }
  0x19   :  { %p530_p12 = scmp.lt.s32.totalorder %s524_s15, %s524_s15 }
  0x1b   :  { %p531_p13 = por %p530_p12, %p529_p11 }
  0x1d   :  { %p532_p0 = pnand %p531_p13, %p525_p10 }
  0x1f   :  { %535 = shalt.err (!%p532_p0)
}
  0x20   :  { %s568_s16 = smov [#allocation3]   ;;  %s536_s17 = scalar_lea.vmem %s45_s14, 128 }
  0x21   :  { %27 = dma.vmem_to_smem %s25_s11, 64, %s568_s16, [#allocation4]  }
  0x22   :  { %p537_p1 = scmp.ne.s32.totalorder %s45_s14, %s536_s17  ;;  %p541_p2 = scmp.lt.s32.totalorder %s45_s14, %s45_s14 }
  0x23   :  { %p542_p3 = scmp.lt.s32.totalorder %s536_s17, %s536_s17 }
  0x25   :  { %p543_p4 = por %p542_p3, %p541_p2 }
  0x27   :  { %p544_p5 = pnand %p543_p4, %p537_p1 }
  0x29   :  { %547 = shalt.err (!%p544_p5)
}
  0x2a   :  { %s569_s1 = smov [#allocation7]   ;;  %s64_s19 = sshll.u32 %s949_s5, 4  ;;  %s65_s19 = int_to_ptr.vmem [resolvable:$true] %s64_s19 }
  0x2b   :  { %47 = dma.vmem_to_smem %s45_s14, 128, %s569_s1, [#allocation6]  }
  0x2c   :  { %s548_s20 = scalar_lea.vmem %s65_s19, 64  ;;  %p553_p7 = scmp.lt.s32.totalorder %s65_s19, %s65_s19 }
  0x2d   :  { %p549_p6 = scmp.ne.s32.totalorder %s65_s19, %s548_s20  ;;  %p554_p8 = scmp.lt.s32.totalorder %s548_s20, %s548_s20 }
  0x2f   :  { %p555_p9 = por %p554_p8, %p553_p7 }
  0x31   :  { %p556_p10 = pnand %p555_p9, %p549_p6 }
  0x33   :  { %559 = shalt.err (!%p556_p10)
}
  0x34   :  { %s570_s21 = smov [#allocation10]  }
  0x35   :  { %67 = dma.vmem_to_smem %s65_s19, 64, %s570_s21, [#allocation9]  }
  0x36   :  { %560 = dma.done.wait [#allocation4], 64  }
  0x37   :  { %561 = vsyncadd [#allocation4], 4294967232 }
  0x38   :  { %562 = dma.done.wait [#allocation6], 144  }
  0x39   :  { %563 = vsyncadd [#allocation6], 4294967152 }
  0x3a   :  { %564 = dma.done.wait [#allocation9], 80  }
  0x3b   :  { %565 = vsyncadd [#allocation9], 4294967216 }
  0x3c   :  { %85 = sfence }
  0x3d   :  { %s86_s22 = sld [smem:[#allocation3]]  ;;  %s417_s23 = sld [smem:[#allocation3 + $0x1]]  ;;  %v167_v0 = vld [vmem:[%s944_s0] sm:$0xff]  ;;  %v652_v7 = vld [vmem:[%s944_s0 + $0x8] sm:$0xff]  ;;  %v681_v24 = vld [vmem:[%s944_s0 + $0x10] sm:$0xff] }
  0x3e   :  { %s418_s5 = sld [smem:[#allocation3 + $0x2]]  ;;  %s419_s24 = sld [smem:[#allocation3 + $0x3]]  ;;  %v710_v41 = vld [vmem:[%s944_s0 + $0x18] sm:$0xff] }
  0x3f   :  { %s420_s25 = sld [smem:[#allocation3 + $0x4]]  ;;  %s421_s26 = sld [smem:[#allocation3 + $0x5]] }
  0x40   :  { %s626_s27 = sld [smem:[#allocation3 + $0x6]]  ;;  %s628_s28 = sld [smem:[#allocation3 + $0x7]] }
  0x41   :  { %s630_s29 = sld [smem:[#allocation3 + $0x80]]  ;;  %s632_s30 = sld [smem:[#allocation3 + $0x81]] }
  0x42   :  { %s637_s2 = sld [smem:[#allocation3 + $0x82]]  ;;  %s639_s4 = sld [smem:[#allocation3 + $0x83]] }
  0x43   :  { %s641_s10 = sld [smem:[#allocation3 + $0x84]]  ;;  %s643_s11 = sld [smem:[#allocation3 + $0x85]]  ;;  %v177_v1 = vstv %s86_s22  ;;  %v191_v2 = vstv %s417_s23 }
  0x44   :  { %v178_v3 = vmul.f32 %v177_v1, %v167_v0  ;;  %v192_v4 = vmul.f32 %v191_v2, %v167_v0  ;;  %v205_v5 = vstv %s418_s5  ;;  %v219_v6 = vstv %s419_s24  ;;  %s645_s12 = sld [smem:[#allocation3 + $0x100]]  ;;  %s647_s13 = sld [smem:[#allocation3 + $0x101]] }
  0x45   :  { %v206_v8 = vmul.f32 %v205_v5, %v167_v0  ;;  %v220_v9 = vmul.f32 %v219_v6, %v167_v0  ;;  %v233_v10 = vstv %s420_s25  ;;  %v247_v11 = vstv %s421_s26  ;;  %s654_s16 = sld [smem:[#allocation3 + $0x102]]  ;;  %s656_s17 = sld [smem:[#allocation3 + $0x103]] }
  0x46   :  { %v234_v12 = vmul.f32 %v233_v10, %v167_v0  ;;  %v248_v13 = vmul.f32 %v247_v11, %v167_v0  ;;  %v261_v14 = vstv %s626_s27  ;;  %v275_v15 = vstv %s628_s28  ;;  %s660_s1 = sld [smem:[#allocation3 + $0x104]]  ;;  %s668_s3 = sld [smem:[#allocation3 + $0x105]] }
  0x47   :  { %v179_v16 = vstv %s630_s29  ;;  %v193_v17 = vstv %s632_s30  ;;  %v664_v18 = vmul.f32 %v261_v14, %v167_v0  ;;  %v666_v19 = vmul.f32 %v275_v15, %v167_v0  ;;  %s674_s18 = sld [smem:[#allocation3 + $0x180]]  ;;  %s676_s19 = sld [smem:[#allocation3 + $0x181]] }
  0x48   :  { %v180_v20 = vmul.f32 %v652_v7, %v179_v16  ;;  %v194_v21 = vmul.f32 %v652_v7, %v193_v17  ;;  %v207_v22 = vstv %s637_s2  ;;  %v221_v23 = vstv %s639_s4  ;;  %s687_s22 = sld [smem:[#allocation3 + $0x182]]  ;;  %s689_s23 = sld [smem:[#allocation3 + $0x183]] }
  0x49   :  { %v208_v25 = vmul.f32 %v652_v7, %v207_v22  ;;  %v222_v26 = vmul.f32 %v652_v7, %v221_v23  ;;  %v235_v27 = vstv %s641_s10  ;;  %v249_v28 = vstv %s643_s11  ;;  %s693_s5 = sld [smem:[#allocation3 + $0x184]]  ;;  %s697_s24 = sld [smem:[#allocation3 + $0x185]] }
  0x4a   :  { %v181_v29 = vadd.f32 %v180_v20, %v178_v3  ;;  %v195_v30 = vadd.f32 %v194_v21, %v192_v4  ;;  %v236_v31 = vmul.f32 %v652_v7, %v235_v27  ;;  %v250_v32 = vmul.f32 %v652_v7, %v249_v28  ;;  %s703_s25 = sld [smem:[#allocation5]]  ;;  %s705_s26 = sld [smem:[#allocation5 + $0x1]] }
  0x4b   :  { %v182_v33 = vstv %s645_s12  ;;  %v196_v34 = vstv %s647_s13  ;;  %v209_v35 = vadd.f32 %v208_v25, %v206_v8  ;;  %v223_v36 = vadd.f32 %v222_v26, %v220_v9  ;;  %s715_s29 = sld [smem:[#allocation5 + $0x2]]  ;;  %s717_s30 = sld [smem:[#allocation5 + $0x3]] }
  0x4c   :  { %v183_v37 = vmul.f32 %v681_v24, %v182_v33  ;;  %v197_v38 = vmul.f32 %v681_v24, %v196_v34  ;;  %v210_v39 = vstv %s654_s16  ;;  %v224_v40 = vstv %s656_s17  ;;  %s720_s8 = sld [smem:[#allocation3 + $0x86]]  ;;  %s722_s0 = sld [smem:[#allocation5 + $0x4]] }
  0x4d   :  { %v211_v42 = vmul.f32 %v681_v24, %v210_v39  ;;  %v225_v43 = vmul.f32 %v681_v24, %v224_v40  ;;  %v237_v44 = vadd.f32 %v236_v31, %v234_v12  ;;  %v238_v45 = vstv %s660_s1  ;;  %s726_s9 = sld [smem:[#allocation3 + $0x106]]  ;;  %s728_s2 = sld [smem:[#allocation5 + $0x5]] }
  0x4e   :  { %v184_v46 = vadd.f32 %v183_v37, %v181_v29  ;;  %v198_v47 = vadd.f32 %v197_v38, %v195_v30  ;;  %v239_v48 = vmul.f32 %v681_v24, %v238_v45  ;;  %v251_v49 = vadd.f32 %v250_v32, %v248_v13  ;;  %s734_s4 = sld [smem:[#allocation3 + $0x186]]  ;;  %s739_s10 = sld [smem:[#allocation3 + $0x87]] }
  0x4f   :  { %v185_v50 = vstv %s674_s18  ;;  %v199_v51 = vstv %s676_s19  ;;  %v212_v52 = vadd.f32 %v211_v42, %v209_v35  ;;  %v226_v53 = vadd.f32 %v225_v43, %v223_v36  ;;  %s741_s11 = sld [smem:[#allocation5 + $0x6]]  ;;  %s745_s12 = sld [smem:[#allocation3 + $0x107]] }
  0x50   :  { %v186_v54 = vmul.f32 %v710_v41, %v185_v50  ;;  %v200_v55 = vmul.f32 %v710_v41, %v199_v51  ;;  %v213_v56 = vstv %s687_s22  ;;  %v227_v57 = vstv %s689_s23  ;;  %s747_s13 = sld [smem:[#allocation3 + $0x187]]  ;;  %s755_s15 = sld [smem:[#allocation7]] }
  0x51   :  { %v214_v58 = vmul.f32 %v710_v41, %v213_v56  ;;  %v228_v59 = vmul.f32 %v710_v41, %v227_v57  ;;  %v240_v60 = vadd.f32 %v239_v48, %v237_v44  ;;  %v241_v61 = vstv %s693_s5  ;;  %s751_s14 = sld [smem:[#allocation5 + $0x7]]  ;;  %s757_s16 = sld [smem:[#allocation7 + $0x80]] }
  0x52   :  { %v187_v62 = vadd.f32 %v186_v54, %v184_v46  ;;  %v201_v63 = vadd.f32 %v200_v55, %v198_v47  ;;  %v242_v0 = vmul.f32 %v710_v41, %v241_v61  ;;  %v252_v1 = vstv %s668_s3  ;;  %s760_s17 = sld [smem:[#allocation7 + $0x100]]  ;;  %s775_s3 = sld [smem:[#allocation7 + $0x1]] }
  0x53   :  { %v188_v2 = vstv %s703_s25  ;;  %v202_v3 = vstv %s705_s26  ;;  %v215_v4 = vadd.f32 %v214_v58, %v212_v52  ;;  %v229_v5 = vadd.f32 %v228_v59, %v226_v53  ;;  %s768_s1 = sld [smem:[#allocation7 + $0x180]]  ;;  %s787_s19 = sld [smem:[#allocation7 + $0x81]] }
  0x54   :  { %v189_v6 = vadd.f32 %v188_v2, %v187_v62  ;;  %v203_v8 = vadd.f32 %v202_v3, %v201_v63  ;;  %v216_v9 = vstv %s715_s29  ;;  %v230_v10 = vstv %s717_s30  ;;  %s780_s18 = sld [smem:[#allocation7 + $0x200]]  ;;  %s798_s21 = sld [smem:[#allocation7 + $0x101]] }
  0x55   :  { %v217_v11 = vadd.f32 %v216_v9, %v215_v4  ;;  %v231_v12 = vadd.f32 %v230_v10, %v229_v5  ;;  %v243_v13 = vadd.f32 %v242_v0, %v240_v60  ;;  %v244_v14 = vstv %s722_s0  ;;  %s792_s20 = sld [smem:[#allocation7 + $0x280]]  ;;  %s800_s22 = sld [smem:[#allocation7 + $0x181]] }
  0x56   :  { %v762_v15 = vmax.f32 %v189_v6, 0.0  ;;  %v764_v16 = vmax.f32 %v203_v8, 0.0  ;;  %v253_v17 = vmul.f32 %v681_v24, %v252_v1  ;;  %v255_v20 = vstv %s697_s24  ;;  %s805_s23 = sld [smem:[#allocation7 + $0x201]]  ;;  %s807_s5 = sld [smem:[#allocation7 + $0x300]] }
  0x57   :  { %v770_v21 = vmax.f32 %v217_v11, 0.0  ;;  %v772_v22 = vmax.f32 %v231_v12, 0.0  ;;  %v245_v23 = vadd.f32 %v244_v14, %v243_v13  ;;  %v256_v25 = vmul.f32 %v710_v41, %v255_v20  ;;  %s817_s24 = sld [smem:[#allocation7 + $0x281]]  ;;  %s819_s25 = sld [smem:[#allocation7 + $0x380]] }
  0x58   :  { %v254_v26 = vadd.f32 %v253_v17, %v251_v49  ;;  %v258_v27 = vstv %s728_s2  ;;  %v263_v28 = vstv %s720_s8  ;;  %v266_v29 = vstv %s726_s9  ;;  %s823_s26 = sld [smem:[#allocation7 + $0x2]]  ;;  %s830_s28 = sld [smem:[#allocation7 + $0x301]] }
  0x59   :  { %v782_v30 = vmax.f32 %v245_v23, 0.0  ;;  %v264_v31 = vmul.f32 %v652_v7, %v263_v28  ;;  %v267_v32 = vmul.f32 %v681_v24, %v266_v29  ;;  %v269_v33 = vstv %s734_s4  ;;  %s828_s27 = sld [smem:[#allocation7 + $0x82]]  ;;  %s833_s29 = sld [smem:[#allocation7 + $0x381]] }
  0x5a   :  { %v257_v34 = vadd.f32 %v256_v25, %v254_v26  ;;  %v270_v35 = vmul.f32 %v710_v41, %v269_v33  ;;  %v272_v36 = vstv %s741_s11  ;;  %v277_v37 = vstv %s739_s10  ;;  %s838_s30 = sld [smem:[#allocation7 + $0x102]]  ;;  %s856_s2 = sld [smem:[#allocation8]] }
  0x5b   :  { %v265_v38 = vadd.f32 %v264_v31, %v664_v18  ;;  %v278_v39 = vmul.f32 %v652_v7, %v277_v37  ;;  %v280_v40 = vstv %s745_s12  ;;  %v283_v42 = vstv %s747_s13  ;;  %s840_s8 = sld [smem:[#allocation7 + $0x182]]  ;;  %s858_s4 = sld [smem:[#allocation8 + $0x1]] }
  0x5c   :  { %v259_v43 = vadd.f32 %v258_v27, %v257_v34  ;;  %v281_v44 = vmul.f32 %v681_v24, %v280_v40  ;;  %v284_v45 = vmul.f32 %v710_v41, %v283_v42  ;;  %v286_v46 = vstv %s751_s14  ;;  %s846_s0 = sld [smem:[#allocation7 + $0x202]]  ;;  %s863_s10 = sld [smem:[#allocation7 + $0x3]] }
  0x5d   :  { %v268_v18 = vadd.f32 %v267_v32, %v265_v38  ;;  %v279_v7 = vadd.f32 %v278_v39, %v666_v19  ;;  %v289_v47 = vstv %s755_s15  ;;  %v291_v48 = vstv %s757_s16  ;;  %s851_s9 = sld [smem:[#allocation7 + $0x282]]  ;;  %s867_s11 = sld [smem:[#allocation7 + $0x83]] }
  0x5e   :  { %v812_v49 = vmax.f32 %v259_v43, 0.0  ;;  %v290_v50 = vmul.f32 %v289_v47, %v762_v15  ;;  %v292_v24 = vmul.f32 %v291_v48, %v764_v16  ;;  %v294_v41 = vstv %s760_s17  ;;  %s869_s12 = sld [smem:[#allocation7 + $0x302]]  ;;  %s872_s13 = sld [smem:[#allocation7 + $0x103]] }
  0x5f   :  { %v271_v51 = vadd.f32 %v270_v35, %v268_v18  ;;  %v282_v52 = vadd.f32 %v281_v44, %v279_v7  ;;  %v295_v19 = vmul.f32 %v294_v41, %v770_v21  ;;  %v297_v53 = vstv %s768_s1  ;;  %s874_s14 = sld [smem:[#allocation7 + $0x183]]  ;;  %s880_s15 = sld [smem:[#allocation7 + $0x382]] }
  0x60   :  { %v293_v54 = vadd.f32 %v292_v24, %v290_v50  ;;  %v298_v55 = vmul.f32 %v297_v53, %v772_v22  ;;  %v300_v56 = vstv %s780_s18  ;;  %v315_v57 = vstv %s775_s3  ;;  %s885_s16 = sld [smem:[#allocation7 + $0x203]]  ;;  %s902_s3 = sld [smem:[#allocation8 + $0x2]] }
  0x61   :  { %v273_v58 = vadd.f32 %v272_v36, %v271_v51  ;;  %v285_v59 = vadd.f32 %v284_v45, %v282_v52  ;;  %v303_v60 = vstv %s792_s20  ;;  %v301_v62 = vmul.f32 %v300_v56, %v782_v30  ;;  %s893_s17 = sld [smem:[#allocation7 + $0x283]]  ;;  %s913_s20 = sld [smem:[#allocation10 + $0x80]] }
  0x62   :  { %v296_v61 = vadd.f32 %v295_v19, %v293_v54  ;;  %v316_v63 = vmul.f32 %v315_v57, %v762_v15  ;;  %v317_v0 = vstv %s787_s19  ;;  %v304_v3 = vmul.f32 %v303_v60, %v812_v49  ;;  %s900_s1 = sld [smem:[#allocation7 + $0x303]]  ;;  %s911_s19 = sld [smem:[#allocation10]] }
  0x63   :  { %v842_v1 = vmax.f32 %v273_v58, 0.0  ;;  %v287_v2 = vadd.f32 %v286_v46, %v285_v59  ;;  %v318_v4 = vmul.f32 %v317_v0, %v764_v16  ;;  %v306_v6 = vstv %s807_s5  ;;  %s906_s18 = sld [smem:[#allocation7 + $0x383]] }
  0x64   :  { %v299_v5 = vadd.f32 %v298_v55, %v296_v61  ;;  %v320_v8 = vstv %s798_s21  ;;  %v323_v9 = vstv %s800_s22  ;;  %v326_v12 = vstv %s805_s23  ;;  %s924_s21 = sld [smem:[#allocation10 + $0x100]]  ;;  %s488_s22 = sld [smem:[#allocation8 + $0x3]] }
  0x65   :  { %v853_v10 = vmax.f32 %v287_v2, 0.0  ;;  %v319_v11 = vadd.f32 %v318_v4, %v316_v63  ;;  %v309_v14 = vstv %s819_s25  ;;  %v321_v17 = vmul.f32 %v320_v8, %v770_v21  ;;  %s491_s23 = sld [smem:[#allocation10 + $0x180]] }
  0x66   :  { %v302_v13 = vadd.f32 %v301_v62, %v299_v5  ;;  %v324_v20 = vmul.f32 %v323_v9, %v772_v22  ;;  %v307_v23 = vmul.f32 %v306_v6, %v842_v1  ;;  %v329_v25 = vstv %s817_s24 }
  0x67   :  { %v322_v27 = vadd.f32 %v321_v17, %v319_v11  ;;  %v327_v28 = vmul.f32 %v326_v12, %v782_v30  ;;  %v310_v29 = vmul.f32 %v309_v14, %v853_v10  ;;  %v332_v31 = vstv %s830_s28 }
  0x68   :  { %v305_v26 = vadd.f32 %v304_v3, %v302_v13  ;;  %v341_v32 = vstv %s823_s26  ;;  %v343_v33 = vstv %s828_s27  ;;  %v330_v35 = vmul.f32 %v329_v25, %v812_v49 }
  0x69   :  { %v325_v34 = vadd.f32 %v324_v20, %v322_v27  ;;  %v335_v36 = vstv %s833_s29  ;;  %v342_v37 = vmul.f32 %v341_v32, %v762_v15  ;;  %v344_v39 = vmul.f32 %v343_v33, %v764_v16 }
  0x6a   :  { %v308_v38 = vadd.f32 %v307_v23, %v305_v26  ;;  %v346_v40 = vstv %s838_s30  ;;  %v349_v42 = vstv %s840_s8  ;;  %v333_v44 = vmul.f32 %v332_v31, %v842_v1 }
  0x6b   :  { %v328_v43 = vadd.f32 %v327_v28, %v325_v34  ;;  %v347_v45 = vmul.f32 %v346_v40, %v770_v21  ;;  %v352_v46 = vstv %s846_s0  ;;  %v345_v18 = vadd.f32 %v344_v39, %v342_v37 }
  0x6c   :  { %v350_v7 = vmul.f32 %v349_v42, %v772_v22  ;;  %v355_v47 = vstv %s851_s9  ;;  %v312_v48 = vstv %s856_s2  ;;  %v336_v24 = vmul.f32 %v335_v36, %v853_v10 }
  0x6d   :  { %v331_v50 = vadd.f32 %v330_v35, %v328_v43  ;;  %v338_v41 = vstv %s858_s4  ;;  %v311_v51 = vadd.f32 %v310_v29, %v308_v38  ;;  %v348_v52 = vadd.f32 %v347_v45, %v345_v18 }
  0x6e   :  { %v353_v19 = vmul.f32 %v352_v46, %v782_v30  ;;  %v367_v53 = vstv %s863_s10  ;;  %v356_v55 = vmul.f32 %v355_v47, %v812_v49  ;;  %v358_v56 = vstv %s869_s12 }
  0x6f   :  { %v334_v54 = vadd.f32 %v333_v44, %v331_v50  ;;  %v368_v57 = vmul.f32 %v367_v53, %v762_v15  ;;  %v351_v58 = vadd.f32 %v350_v7, %v348_v52  ;;  %v369_v59 = vstv %s867_s11 }
  0x70   :  { %v372_v60 = vstv %s872_s13  ;;  %v375_v61 = vstv %s874_s14  ;;  %v361_v63 = vstv %s880_s15  ;;  %v370_v0 = vmul.f32 %v369_v59, %v764_v16 }
  0x71   :  { %v337_v62 = vadd.f32 %v336_v24, %v334_v54  ;;  %v373_v2 = vmul.f32 %v372_v60, %v770_v21  ;;  %v354_v3 = vadd.f32 %v353_v19, %v351_v58  ;;  %v359_v15 = vmul.f32 %v358_v56, %v842_v1 }
  0x72   :  { %v378_v4 = vstv %s885_s16  ;;  %v313_v5 = vadd.f32 %v312_v48, %v311_v51  ;;  %v371_v8 = vadd.f32 %v370_v0, %v368_v57  ;;  %v376_v9 = vmul.f32 %v375_v61, %v772_v22 }
  0x73   :  { %v339_v6 = vadd.f32 %v338_v41, %v337_v62  ;;  %v357_v11 = vadd.f32 %v356_v55, %v354_v3  ;;  %v362_v16 = vmul.f32 %v361_v63, %v853_v10  ;;  %v381_v21 = vstv %s893_s17 }
  0x74   :  { %v374_v12 = vadd.f32 %v373_v2, %v371_v8  ;;  %v379_v13 = vmul.f32 %v378_v4, %v782_v30  ;;  %v364_v17 = vstv %s902_s3  ;;  %v384_v20 = vstv %s900_s1 }
  0x75   :  { %v360_v14 = vadd.f32 %v359_v15, %v357_v11  ;;  %v314_v23 = vmax.f32 %v313_v5, 0.0  ;;  %v340_v25 = vmax.f32 %v339_v6, 0.0  ;;  %v382_v26 = vmul.f32 %v381_v21, %v812_v49 }
  0x76   :  { %v377_v22 = vadd.f32 %v376_v9, %v374_v12  ;;  %v387_v28 = vstv %s906_s18  ;;  %v393_v29 = vstv %s911_s19  ;;  %v395_v31 = vstv %s913_s20 }
  0x77   :  { %v363_v27 = vadd.f32 %v362_v16, %v360_v14  ;;  %v385_v33 = vmul.f32 %v384_v20, %v842_v1  ;;  %v388_v35 = vmul.f32 %v387_v28, %v853_v10  ;;  %v394_v36 = vmul.f32 %v393_v29, %v314_v23 }
  0x78   :  { %v380_v32 = vadd.f32 %v379_v13, %v377_v22  ;;  %v396_v37 = vmul.f32 %v395_v31, %v340_v25  ;;  %v398_v39 = vstv %s924_s21  ;;  %v390_v42 = vstv %s488_s22 }
  0x79   :  { %v365_v34 = vadd.f32 %v364_v17, %v363_v27  ;;  %v401_v46 = vstv %s491_s23  ;;  %v404_v1 = vstv %s950_s6 }
  0x7a   :  { %v383_v30 = vadd.f32 %v382_v26, %v380_v32  ;;  %v397_v49 = vadd.f32 %v396_v37, %v394_v36 }
  0x7b   :  { %v366_v38 = vmax.f32 %v365_v34, 0.0 }
  0x7c   :  { %v386_v40 = vadd.f32 %v385_v33, %v383_v30 }
  0x7d   :  { %v399_v44 = vmul.f32 %v398_v39, %v366_v38 }
  0x7e   :  { %v389_v43 = vadd.f32 %v388_v35, %v386_v40 }
  0x7f   :  { %v400_v7 = vadd.f32 %v399_v44, %v397_v49 }
  0x80   :  { %v391_v45 = vadd.f32 %v390_v42, %v389_v43 }
  0x82   :  { %v392_v18 = vmax.f32 %v391_v45, 0.0 }
  0x84   :  { %v402_v47 = vmul.f32 %v401_v46, %v392_v18 }
  0x86   :  { %v403_v48 = vadd.f32 %v402_v47, %v400_v7 }
  0x88   :  { %v405_v10 = vadd.f32 %v404_v1, %v403_v48 }
  0x8a   :  { %406 = vst [vmem:[%s951_s7] sm:$0xff] %v405_v10 }
  0x8b   :  { %411 = vsyncpa [#allocation4], 1 }
  0x8c   :  { %412 = vsyncpa [#allocation6], 1 }
  0x8d   :  { %413 = vsyncpa [#allocation9], 1 }

</bundles_post_ra>
